<compile_context>
chip_gen: v5e
topology: v5e:2x2
jax: 0.10.0
libtpu: 0.0.40
codegen_flags: <defaults>
</compile_context>

<pallas_src>
import jax
import jax.numpy as jnp
from jax.experimental import pallas as pl
from jax.experimental.pallas import tpu as pltpu

LANE = 128       # vreg lane width
SUBLANE = 8      # f32 sublane count
NEG_FILL = -1e30  # padded-class bias: exp() underflows to exactly 0


def _round_up(x, m):
    return (x + m - 1) // m * m


# ----------------------------------------------------------------------------
# Kernel: one (tile, IN_PAD) slab of activations -> (tile, L_PAD) log-probs.
# Weights arrive pre-padded (bf16); biases are f32.  Padded W1 cols / b1 lanes
# are zero (padded hidden lanes are exactly 0); padded W2 cols are zero and
# padded b2 lanes are NEG_FILL, so padded logits vanish under the softmax.
# ----------------------------------------------------------------------------
def mnist_nn2_kernel(x_ref, w1_ref, b1_ref, w2_ref, b2_ref, o_ref):
    # bf16 MXU operands; f32 accumulation.
    x = x_ref[...].astype(jnp.bfloat16)                        # (tile, IN_PAD)

    h = jnp.dot(x, w1_ref[...], preferred_element_type=jnp.float32) + b1_ref[...]
    h = jnp.maximum(h, 0.0)                                    # (tile, H_PAD) f32

    logits = (jnp.dot(h.astype(jnp.bfloat16), w2_ref[...],
                      preferred_element_type=jnp.float32)
              + b2_ref[...])                                   # (tile, L_PAD) f32

    # Numerically stable log_softmax along the lane axis (all in f32).
    # Padded lanes are ~-1e30: they never win the max and exp() -> 0 exactly.
    m = jnp.max(logits, axis=-1, keepdims=True)
    shifted = logits - m
    lse = jnp.log(jnp.sum(jnp.exp(shifted), axis=-1, keepdims=True))
    o_ref[...] = (shifted - lse).astype(o_ref.dtype)


# ----------------------------------------------------------------------------
# One-time parameter preparation (padding + bf16 cast hoisted out of the
# per-call path).  Weights are stored as (in, out), transposed vs torch.
# ----------------------------------------------------------------------------
def prepare_params(w1, b1, w2, b2):
    input_dim, inter_dim = w1.shape
    labels_dim = w2.shape[1]
    in_pad = _round_up(input_dim, LANE)
    h_pad = _round_up(inter_dim, LANE)
    l_pad = _round_up(labels_dim, LANE)

    w1p = (jnp.zeros((in_pad, h_pad), jnp.bfloat16)
           .at[:input_dim, :inter_dim].set(w1.astype(jnp.bfloat16)))
    b1p = (jnp.zeros((1, h_pad), jnp.float32)
           .at[0, :inter_dim].set(b1.astype(jnp.float32)))
    w2p = (jnp.zeros((h_pad, l_pad), jnp.bfloat16)
           .at[:inter_dim, :labels_dim].set(w2.astype(jnp.bfloat16)))
    # Bake the padded-class mask into b2: padded lanes get a huge negative
    # bias (padded W2 columns are zero, so those logits equal the bias).
    b2p = (jnp.full((1, l_pad), NEG_FILL, jnp.float32)
           .at[0, :labels_dim].set(b2.astype(jnp.float32)))

    meta = dict(input_dim=input_dim, inter_dim=inter_dim, labels_dim=labels_dim,
                in_pad=in_pad, h_pad=h_pad, l_pad=l_pad)
    return (w1p, b1p, w2p, b2p), meta


# ----------------------------------------------------------------------------
# Batched forward: (B, input_dim) -> (B, labels_dim) log-probabilities.
# ----------------------------------------------------------------------------
def mnist_nn2_batched(x, params, meta, *, m_tile=2048):
    w1p, b1p, w2p, b2p = params
    B, D = x.shape
    assert D == meta["input_dim"]
    in_pad, l_pad = meta["in_pad"], meta["l_pad"]
    h_pad, labels_dim = meta["h_pad"], meta["labels_dim"]

    # Matmul operands are narrowed in-kernel; keep the HBM stream as-is.
    if x.dtype not in (jnp.float32, jnp.bfloat16):
        x = x.astype(jnp.float32)

    # No host-side copy of x when the feature dim is already lane-aligned
    # (input_dim=256 is).  Only pad columns in the rare unaligned case.
    if D != in_pad:
        x = jnp.zeros((B, in_pad), x.dtype).at[:, :D].set(x)

    # Tile selection: big tiles amortize the ~0.35us/step overhead; capping
    # near ceil(B/2) keeps >=2 grid steps so the "parallel" axis uses both
    # v7x TensorCores.  tile=2048 keeps the footprint ~6 MiB (< v5e's 16 MiB
    # scoped-VMEM default), so no vmem_limit_bytes override is needed.
    tile = max(SUBLANE, min(m_tile, _round_up(pl.cdiv(B, 2), SUBLANE)))
    grid = (pl.cdiv(B, tile),)

    out = pl.pallas_call(
        mnist_nn2_kernel,
        out_shape=jax.ShapeDtypeStruct((B, l_pad), jnp.float32),
        grid=grid,
        in_specs=[
            pl.BlockSpec((tile, in_pad), lambda i: (i, 0)),   # x: batch-tiled
            pl.BlockSpec((in_pad, h_pad), lambda i: (0, 0)),  # W1 (bf16), resident
            pl.BlockSpec((1, h_pad), lambda i: (0, 0)),       # b1 (f32), resident
            pl.BlockSpec((h_pad, l_pad), lambda i: (0, 0)),   # W2 (bf16), resident
            pl.BlockSpec((1, l_pad), lambda i: (0, 0)),       # b2 (f32, -1e30 pad)
        ],
        out_specs=pl.BlockSpec((tile, l_pad), lambda i: (i, 0)),
        compiler_params=pltpu.CompilerParams(
            dimension_semantics=("parallel",)),               # shard batch over TCs
    )(x, w1p, b1p, w2p, b2p)

    # Lane slice back to the module's (B, labels_dim) shape (tiny copy).
    return out[:, :labels_dim]


# ----------------------------------------------------------------------------
# Module-faithful forward: single image -> (1, labels_dim), like
# MnistNN2.forward(img) with img.view(1, -1).
# ----------------------------------------------------------------------------
def mnist_nn2_forward(img, params, meta):
    return mnist_nn2_batched(img.reshape(1, -1), params, meta)


# ----------------------------------------------------------------------------
# References + init
# ----------------------------------------------------------------------------
def reference_forward(x, w1, b1, w2, b2):
    h = jnp.maximum(x @ w1 + b1, 0.0)
    logits = h @ w2 + b2
    return jax.nn.log_softmax(logits, axis=-1)


def reference_forward_bf16ops(x, w1, b1, w2, b2):
    """Emulates the kernel's bf16 matmul operands / f32 accumulation."""
    h = jnp.dot(x.astype(jnp.bfloat16), w1.astype(jnp.bfloat16),
                preferred_element_type=jnp.float32) + b1
    h = jnp.maximum(h, 0.0)
    logits = jnp.dot(h.astype(jnp.bfloat16), w2.astype(jnp.bfloat16),
                     preferred_element_type=jnp.float32) + b2
    return jax.nn.log_softmax(logits, axis=-1)


def init_params(key, input_dim, inter_dim, labels_dim):
    """Mirror nn.Linear's U(-1/sqrt(fan_in), 1/sqrt(fan_in)) init."""
    k1, k2, k3, k4 = jax.random.split(key, 4)
    lim1 = 1.0 / jnp.sqrt(jnp.float32(input_dim))
    lim2 = 1.0 / jnp.sqrt(jnp.float32(inter_dim))
    w1 = jax.random.uniform(k1, (input_dim, inter_dim), jnp.float32, -lim1, lim1)
    b1 = jax.random.uniform(k2, (inter_dim,), jnp.float32, -lim1, lim1)
    w2 = jax.random.uniform(k3, (inter_dim, labels_dim), jnp.float32, -lim2, lim2)
    b2 = jax.random.uniform(k4, (labels_dim,), jnp.float32, -lim2, lim2)
    return w1, b1, w2, b2


if __name__ == "__main__":
    # Shapes consistent with the module: 16x16 "images"
    # -> input_dim = 256, inter_dim = 32, labels_dim = 10.
    input_dim, inter_dim, labels_dim = 256, 32, 10

    key = jax.random.PRNGKey(0)
    k_img, k_batch, k_rem, k_params = jax.random.split(key, 4)

    w1, b1, w2, b2 = init_params(k_params, input_dim, inter_dim, labels_dim)
    params, meta = prepare_params(w1, b1, w2, b2)   # one-time pad/cast (bf16)

    # --- module-faithful single-image forward: img.view(1, -1) -> (1, 10) ---
    img = jax.random.normal(k_img, (16, 16), dtype=jnp.float32)
    log_probs = jax.block_until_ready(mnist_nn2_forward(img, params, meta))
    assert log_probs.shape == (1, labels_dim)
    x1 = img.reshape(1, -1)
    ref1_bf = reference_forward_bf16ops(x1, w1, b1, w2, b2)
    ref1_f32 = reference_forward(x1, w1, b1, w2, b2)
    assert jnp.allclose(log_probs, ref1_bf, atol=1e-3), (
        float(jnp.max(jnp.abs(log_probs - ref1_bf))))
    assert jnp.allclose(log_probs, ref1_f32, atol=2e-2), (
        float(jnp.max(jnp.abs(log_probs - ref1_f32))))
    total_prob = float(jnp.sum(jnp.exp(log_probs)))
    assert abs(total_prob - 1.0) < 1e-3, total_prob

    # --- batched path (2 grid steps, exactly divisible) ---
    xb = jax.random.normal(k_batch, (64, input_dim), dtype=jnp.float32)
    out_b = jax.block_until_ready(mnist_nn2_batched(xb, params, meta))
    assert out_b.shape == (64, labels_dim)
    assert jnp.allclose(out_b, reference_forward_bf16ops(xb, w1, b1, w2, b2),
                        atol=1e-3)
    assert jnp.allclose(out_b, reference_forward(xb, w1, b1, w2, b2), atol=2e-2)

    # --- non-divisible batch (exercises the partial last block path) ---
    xr = jax.random.normal(k_rem, (19, input_dim), dtype=jnp.float32)
    out_r = jax.block_until_ready(mnist_nn2_batched(xr, params, meta))
    assert out_r.shape == (19, labels_dim)
    assert jnp.allclose(out_r, reference_forward_bf16ops(xr, w1, b1, w2, b2),
                        atol=1e-3)

    print("KERNEL_OK")
</pallas_src>

<mosaic_0001>
module attributes {stable_mosaic.version = 11 : i64} {
  func.func @mnist_nn2_kernel(%arg0: i32, %arg1: memref<8x256xf32, #tpu.memory_space<vmem>>, %arg2: memref<256x128xbf16, #tpu.memory_space<vmem>>, %arg3: memref<1x128xf32, #tpu.memory_space<vmem>>, %arg4: memref<128x128xbf16, #tpu.memory_space<vmem>>, %arg5: memref<1x128xf32, #tpu.memory_space<vmem>>, %arg6: memref<8x128xf32, #tpu.memory_space<vmem>>) attributes {dimension_semantics = [#tpu.dimension_semantics<parallel>], iteration_bounds = array<i64: 1>, scalar_prefetch = 0 : i64, scratch_operands = 0 : i64, tpu.core_type = #tpu.core_type<tc>, window_params = [{transform_indices = @transform_0, window_bounds = array<i64: 8, 256>}, {pipeline_mode = #tpu.pipeline_mode<synchronous>, transform_indices = @transform_1, window_bounds = array<i64: 256, 128>}, {pipeline_mode = #tpu.pipeline_mode<synchronous>, transform_indices = @transform_2, window_bounds = array<i64: 1, 128>}, {pipeline_mode = #tpu.pipeline_mode<synchronous>, transform_indices = @transform_3, window_bounds = array<i64: 128, 128>}, {pipeline_mode = #tpu.pipeline_mode<synchronous>, transform_indices = @transform_4, window_bounds = array<i64: 1, 128>}, {transform_indices = @transform_5, window_bounds = array<i64: 8, 128>}]} {
    %c0 = arith.constant 0 : index
    %c0_0 = arith.constant 0 : index
    %0 = vector.load %arg1[%c0, %c0_0] : memref<8x256xf32, #tpu.memory_space<vmem>>, vector<8x256xf32>
    %1 = arith.truncf %0 : vector<8x256xf32> to vector<8x256xbf16>
    %c0_1 = arith.constant 0 : index
    %c0_2 = arith.constant 0 : index
    %2 = vector.load %arg2[%c0_1, %c0_2] : memref<256x128xbf16, #tpu.memory_space<vmem>>, vector<256x128xbf16>
    %cst = arith.constant dense<0.000000e+00> : vector<8x128xf32>
    %3 = tpu.matmul %1, %2, %cst {dimension_numbers = #tpu.dot_dimension_numbers<[1], [0], [0], [1], [0, 0, 1, 1], [], []>} : vector<8x256xbf16>, vector<256x128xbf16>, vector<8x128xf32> -> vector<8x128xf32>
    %c0_3 = arith.constant 0 : index
    %c0_4 = arith.constant 0 : index
    %4 = vector.load %arg3[%c0_3, %c0_4] : memref<1x128xf32, #tpu.memory_space<vmem>>, vector<1x128xf32>
    %5 = vector.broadcast %4 : vector<1x128xf32> to vector<8x128xf32>
    %6 = arith.addf %3, %5 : vector<8x128xf32>
    %cst_5 = arith.constant 0.000000e+00 : f32
    %7 = vector.broadcast %cst_5 : f32 to vector<8x128xf32>
    %8 = arith.maximumf %6, %7 : vector<8x128xf32>
    %9 = arith.truncf %8 : vector<8x128xf32> to vector<8x128xbf16>
    %c0_6 = arith.constant 0 : index
    %c0_7 = arith.constant 0 : index
    %10 = vector.load %arg4[%c0_6, %c0_7] : memref<128x128xbf16, #tpu.memory_space<vmem>>, vector<128x128xbf16>
    %cst_8 = arith.constant dense<0.000000e+00> : vector<8x128xf32>
    %11 = tpu.matmul %9, %10, %cst_8 {dimension_numbers = #tpu.dot_dimension_numbers<[1], [0], [0], [1], [0, 0, 1, 1], [], []>} : vector<8x128xbf16>, vector<128x128xbf16>, vector<8x128xf32> -> vector<8x128xf32>
    %c0_9 = arith.constant 0 : index
    %c0_10 = arith.constant 0 : index
    %12 = vector.load %arg5[%c0_9, %c0_10] : memref<1x128xf32, #tpu.memory_space<vmem>>, vector<1x128xf32>
    %13 = vector.broadcast %12 : vector<1x128xf32> to vector<8x128xf32>
    %14 = arith.addf %11, %13 : vector<8x128xf32>
    %cst_11 = arith.constant dense<0xFF800000> : vector<8xf32>
    %15 = vector.multi_reduction <maximumf>, %14, %cst_11 [1] : vector<8x128xf32> to vector<8xf32>
    %16 = vector.shape_cast %15 : vector<8xf32> to vector<8x1xf32>
    %17 = vector.broadcast %16 : vector<8x1xf32> to vector<8x128xf32>
    %18 = arith.subf %14, %17 : vector<8x128xf32>
    %19 = math.exp %18 : vector<8x128xf32>
    %cst_12 = arith.constant dense<0.000000e+00> : vector<8xf32>
    %20 = vector.multi_reduction <add>, %19, %cst_12 [1] : vector<8x128xf32> to vector<8xf32>
    %21 = vector.shape_cast %20 : vector<8xf32> to vector<8x1xf32>
    %22 = math.log %21 : vector<8x1xf32>
    %23 = vector.broadcast %22 : vector<8x1xf32> to vector<8x128xf32>
    %24 = arith.subf %18, %23 : vector<8x128xf32>
    %c0_13 = arith.constant 0 : index
    %c0_14 = arith.constant 0 : index
    %25 = vector.load %arg6[%c0_13, %c0_14] : memref<8x128xf32, #tpu.memory_space<vmem>>, vector<8x128xf32>
    tpu.vector_store %arg6[%c0_13, %c0_14], %24 {strides = array<i32>} : memref<8x128xf32, #tpu.memory_space<vmem>>, vector<8x128xf32>,
    return
  }
  func.func @transform_0(%arg0: i32) -> (i32, i32) {
    %c0_i32 = arith.constant 0 : i32
    %c0_i32_0 = arith.constant 0 : i32
    return %arg0, %c0_i32 : i32, i32
  }
  func.func @transform_1(%arg0: i32) -> (i32, i32) {
    %c0_i32 = arith.constant 0 : i32
    %c0_i32_0 = arith.constant 0 : i32
    %c0_i32_1 = arith.constant 0 : i32
    return %c0_i32, %c0_i32_0 : i32, i32
  }
  func.func @transform_2(%arg0: i32) -> (i32, i32) {
    %c0_i32 = arith.constant 0 : i32
    %c0_i32_0 = arith.constant 0 : i32
    %c0_i32_1 = arith.constant 0 : i32
    return %c0_i32, %c0_i32_0 : i32, i32
  }
  func.func @transform_3(%arg0: i32) -> (i32, i32) {
    %c0_i32 = arith.constant 0 : i32
    %c0_i32_0 = arith.constant 0 : i32
    %c0_i32_1 = arith.constant 0 : i32
    return %c0_i32, %c0_i32_0 : i32, i32
  }
  func.func @transform_4(%arg0: i32) -> (i32, i32) {
    %c0_i32 = arith.constant 0 : i32
    %c0_i32_0 = arith.constant 0 : i32
    %c0_i32_1 = arith.constant 0 : i32
    return %c0_i32, %c0_i32_0 : i32, i32
  }
  func.func @transform_5(%arg0: i32) -> (i32, i32) {
    %c0_i32 = arith.constant 0 : i32
    %c0_i32_0 = arith.constant 0 : i32
    return %arg0, %c0_i32 : i32, i32
  }
}

</mosaic_0001>

<bundles_post_ra>
// kernel: tpu_custom_call.1
= control target key start
LH: loop header
LB: loop body
LE: loop exit
PB: predicated region body
PF: predicated region fallthrough
CT: control target
= control target key end

     0   :  { %10 = vsyncpa [#allocation3], 0  ;;  %s673_s0 = inlined_call_operand.hbm [shape: f32[1,256], index: 0, kind: input, shape index: {}]   ;;  %s674_s1 = inlined_call_operand.hbm [shape: bf16[256,128], index: 1, kind: input, shape index: {}]   ;;  %s675_s2 = inlined_call_operand.vmem [shape: f32[1,128], index: 2, kind: input, shape index: {}]   ;;  %s676_s3 = inlined_call_operand.hbm [shape: bf16[128,128], index: 3, kind: input, shape index: {}]   ;;  %s677_s4 = inlined_call_operand.vmem [shape: f32[1,128], index: 4, kind: input, shape index: {}]   ;;  %s678_s5 = inlined_call_operand.hbm [shape: f32[1,128], index: 5, kind: output, shape index: {}]  }
   0x1   :  { %11 = vsyncpa [#allocation6], 0 }
   0x2   :  { %12 = vsyncpa [#allocation4], 0  ;;  %s30_s20 = sshll.u32 %s674_s1, 4  ;;  %s31_s20 = int_to_ptr.hbm [resolvable:$true] %s30_s20 }
   0x3   :  { %16 = vsyncadd [#allocation3], 224  ;;  %s615_s21 = smov [#allocation5]   ;;  %s17_s25 = sshll.u32 %s673_s0, 4  ;;  %s18_s25 = int_to_ptr.hbm [resolvable:$true] %s17_s25 }
   0x4   :  { %s32_s22 = sshll.u32 %s615_s21, 4  ;;  %s616_s26 = smov 64   ;;  %s33_s22 = int_to_ptr.vmem [resolvable:$true] %s32_s22 }
   0x5   :  { %s617_s27 = smov 4   ;;  %s618_s28 = smov [#allocation2]  }
   0x6   :  { %38 = dma.hbm_to_vmem [thread:$0]  %s31_s20, 2048, %s33_s22, [#allocation6], %s616_s26, %s616_s26, %s617_s27  }
   0x7   :  { %s19_s29 = sshll.u32 %s618_s28, 4  ;;  %s619_s30 = smov 32   ;;  %s20_s29 = int_to_ptr.vmem [resolvable:$true] %s19_s29 }
   0x8   :  { %s620_s6 = smov 2   ;;  %s45_s8 = sshll.u32 %s676_s3, 4  ;;  %s46_s8 = int_to_ptr.hbm [resolvable:$true] %s45_s8 }
   0x9   :  { %25 = dma.hbm_to_vmem [thread:$0]  %s18_s25, 32, %s20_s29, [#allocation3], %s619_s30, %s619_s30, %s620_s6  }
   0xa   :  { %s621_s9 = smov [#allocation7]  }
   0xb   :  { %s47_s10 = sshll.u32 %s621_s9, 4  ;;  %s48_s10 = int_to_ptr.vmem [resolvable:$true] %s47_s10 }
   0xc   :  { %53 = dma.hbm_to_vmem [thread:$0]  %s46_s8, 1024, %s48_s10, [#allocation6], %s616_s26, %s616_s26, %s617_s27  }
   0xd   :  { %609 = dma.done.wait [#allocation3], 256  }
   0xe   :  { %610 = vsyncadd [#allocation3], 4294967040 }
   0xf   :  { %611 = dma.done.wait [#allocation6], 3072  }
  0x10   :  { %612 = vsyncadd [#allocation6], 4294964224  ;;  %v480_v0 = vld [vmem:[#allocation5 + $0x38] sm:$0xff]  ;;  %v479_v2 = vld [vmem:[#allocation5 + $0x30] sm:$0xff] }
  0x11   :  { %v488_v1 = vld [vmem:[#allocation5 + $0x78] sm:$0xff]  ;;  %237 = vmatpush.bf16.msra.mxu0 %v480_v0  ;;  %v487_v3 = vld [vmem:[#allocation5 + $0x70] sm:$0xff]  ;;  %v478_v5 = vld [vmem:[#allocation5 + $0x28] sm:$0xff] }
  0x12   :  { %250 = vmatpush.bf16.msra.mxu1 %v488_v1  ;;  %v68_v4 = vld [vmem:[#allocation2] sm:$0x3]  ;;  %v486_v6 = vld [vmem:[#allocation5 + $0x68] sm:$0xff]  ;;  %v69_v7 = vld [vmem:[#allocation2 + $0x2] sm:$0x3] }
  0x13   :  { %v70_v8 = vld [vmem:[#allocation2 + $0x4] sm:$0x3]  ;;  %v477_v9 = vld [vmem:[#allocation5 + $0x20] sm:$0xff]  ;;  %v71_v11 = vld [vmem:[#allocation2 + $0x6] sm:$0x3] }
  0x14   :  { %v485_v10 = vld [vmem:[#allocation5 + $0x60] sm:$0xff]  ;;  %84 = vst [vmem:[#allocation1] ss:$9 sm:$0xff] %v68_v4  ;;  %v496_v12 = vld [vmem:[#allocation7 + $0x38] sm:$0xff]  ;;  %v495_v16 = vld [vmem:[#allocation7 + $0x30] sm:$0xff] }
  0x15   :  { %238 = vmatpush.bf16.msra.mxu0 %v479_v2  ;;  %v72_v13 = vld [vmem:[#allocation2 + $0x8] sm:$0x3]  ;;  %v73_v14 = vld [vmem:[#allocation2 + $0xa] sm:$0x3]  ;;  %86 = vst [vmem:[#allocation1 + $0x1] ss:$9 sm:$0xff] %v69_v7  ;;  %333 = vmatpush.bf16.msra.mxu2 %v496_v12 }
  0x16   :  { %251 = vmatpush.bf16.msra.mxu1 %v487_v3  ;;  %v74_v15 = vld [vmem:[#allocation2 + $0xc] sm:$0x3]  ;;  %88 = vst [vmem:[#allocation1 + $0x2] ss:$9 sm:$0xff] %v70_v8  ;;  %v75_v17 = vld [vmem:[#allocation2 + $0xe] sm:$0x3] }
  0x17   :  { %90 = vst [vmem:[#allocation1 + $0x3] ss:$9 sm:$0xff] %v71_v11  ;;  %v476_v18 = vld [vmem:[#allocation5 + $0x18] sm:$0xff]  ;;  %v494_v20 = vld [vmem:[#allocation7 + $0x28] sm:$0xff]  ;;  %v475_v21 = vld [vmem:[#allocation5 + $0x10] sm:$0xff] }
  0x18   :  { %92 = vst [vmem:[#allocation1 + $0x4] ss:$9 sm:$0xff] %v72_v13  ;;  %v484_v19 = vld [vmem:[#allocation5 + $0x58] sm:$0xff]  ;;  %v483_v22 = vld [vmem:[#allocation5 + $0x50] sm:$0xff]  ;;  %v493_v23 = vld [vmem:[#allocation7 + $0x20] sm:$0xff] }
  0x19   :  { %239 = vmatpush.bf16.msra.mxu0 %v478_v5  ;;  %94 = vst [vmem:[#allocation1 + $0x5] ss:$9 sm:$0xff] %v73_v14  ;;  %334 = vmatpush.bf16.msra.mxu2 %v495_v16  ;;  %v474_v24 = vld [vmem:[#allocation5 + $0x8] sm:$0xff]  ;;  %v492_v26 = vld [vmem:[#allocation7 + $0x18] sm:$0xff]  ;;  %v473_v27 = vld [vmem:[#allocation5] sm:$0xff] }
  0x1a   :  { %252 = vmatpush.bf16.msra.mxu1 %v486_v6  ;;  %96 = vst [vmem:[#allocation1 + $0x6] ss:$9 sm:$0xff] %v74_v15  ;;  %v482_v25 = vld [vmem:[#allocation5 + $0x48] sm:$0xff]  ;;  %v481_v28 = vld [vmem:[#allocation5 + $0x40] sm:$0xff]  ;;  %v491_v31 = vld [vmem:[#allocation7 + $0x10] sm:$0xff] }
  0x1b   :  { %98 = vst [vmem:[#allocation1 + $0x7] ss:$9 sm:$0xff] %v75_v17  ;;  %v490_v34 = vld [vmem:[#allocation7 + $0x8] sm:$0xff]  ;;  %v489_v35 = vld [vmem:[#allocation7] sm:$0xff] }
  0x1c   :  { %v507_v36 = vld [vmem:[%s675_s2] ss:$0 sm:$0xff] }
  0x1d   :  { %240 = vmatpush.bf16.msra.mxu0 %v477_v9  ;;  %335 = vmatpush.bf16.msra.mxu2 %v494_v20  ;;  %v508_v45 = vld [vmem:[%s677_s4] ss:$0 sm:$0xff] }
  0x1e   :  { %253 = vmatpush.bf16.msra.mxu1 %v485_v10 }
  0x21   :  { %241 = vmatpush.bf16.msra.mxu0 %v476_v18  ;;  %336 = vmatpush.bf16.msra.mxu2 %v493_v23 }
  0x22   :  { %254 = vmatpush.bf16.msra.mxu1 %v484_v19  ;;  %v99_v29 = vld [vmem:[#allocation1] sm:$0xff]  ;;  %v100_v30 = vld [vmem:[#allocation1 + $0x9] sm:$0xff] }
  0x23   :  { %v103_v32 = vpack.c.bf16 %v99_v29, %v99_v29  ;;  %v104_v33 = vpack.c.bf16 %v100_v30, %v100_v30 }
  0x25   :  { %242 = vmatpush.bf16.msra.mxu0 %v475_v21  ;;  %337 = vmatpush.bf16.msra.mxu2 %v492_v26 }
  0x26   :  { %255 = vmatpush.bf16.msra.mxu1 %v483_v22 }
  0x29   :  { %243 = vmatpush.bf16.msra.mxu0 %v474_v24  ;;  %338 = vmatpush.bf16.msra.mxu2 %v491_v31 }
  0x2a   :  { %256 = vmatpush.bf16.msra.mxu1 %v482_v25 }
  0x2d   :  { %244 = vmatpush.bf16.msra.mxu0 %v473_v27  ;;  %339 = vmatpush.bf16.msra.mxu2 %v490_v34 }
  0x2e   :  { %257 = vmatpush.bf16.msra.mxu1 %v481_v28 }
  0x30   :  { %245 = vmatmul.bf16.vlgmr.msra.gmra.mxu0 %v103_v32 }
  0x31   :  { %258 = vmatmul.bf16.vlgmr.msra.gmra.mxu1 %v104_v33  ;;  %340 = vmatpush.bf16.msra.mxu2 %v489_v35 }
  0xad   :  { %v246_v37 = vpop.f32.mrf.mxu0 }
  0xae   :  { %v259_v38 = vpop.f32.mrf.mxu1  ;;  %v247_v39 = vadd.f32 %v507_v36, %v246_v37 }
  0xb0   :  { %v260_v40 = vadd.f32 %v259_v38, %v247_v39 }
  0xb2   :  { %v263_v41 = vmax.f32 %v260_v40, 0.0 }
  0xb4   :  { %v264_v42 = vpack.c.bf16 %v263_v41, %v263_v41 }
  0xb5   :  { %v248_v43 = vpop.f32.mrf.mxu0 }
  0xb6   :  { %v261_v44 = vpop.f32.mrf.mxu1  ;;  %341 = vmatmul.bf16.vlgmr.msra.gmra.mxu2 %v264_v42 }
 0x139   :  { %v342_v46 = vpop.f32.mrf.mxu2 }
 0x13a   :  { %v343_v47 = vadd.f32 %v508_v45, %v342_v46 }
 0x13c   :  { %346 = vmax.xlane.f32.xlu0 %v343_v47 }
 0x141   :  { %v344_v48 = vpop.f32.mrf.mxu2 }
 0x1af   :  { %v347_v49 = vpop.xlane.xlu0 %346 }
 0x1b0   :  { %v348_v50 = vsub.f32 %v343_v47, %v347_v49 }
 0x1b2   :  { %v349_v51 = vmul.f32 1.442695, %v348_v50 }
 0x1b4   :  { %509 = vpow2.f32 %v349_v51 }
 0x1ba   :  { %v510_v52 = vpop.eup %509 }
 0x1bb   :  { %351 = vadd.xlane.f32.xlu0 %v510_v52 }
 0x22e   :  { %v352_v53 = vpop.xlane.xlu0 %351 }
 0x22f   :  { %511 = vlog2.f32 %v352_v53 }
 0x235   :  { %v512_v54 = vpop.eup %511 }
 0x236   :  { %v354_v55 = vmul.f32 0.6931472, %v512_v54 }
 0x238   :  { %v355_v56 = vsub.f32 %v348_v50, %v354_v55 }
 0x23a   :  { %356 = vst [vmem:[#allocation8] sm:$0xff] %v355_v56 }
 0x23b   :  { %360 = vsyncadd [#allocation4], 112  ;;  %s363_s4 = sshll.u32 %s678_s5, 4  ;;  %s622_s14 = smov [#allocation8]   ;;  %s364_s4 = int_to_ptr.hbm [resolvable:$true] %s363_s4 }
 0x23c   :  { %s361_s15 = sshll.u32 %s622_s14, 4  ;;  %s623_s16 = smov 16   ;;  %s362_s15 = int_to_ptr.vmem [resolvable:$true] %s361_s15 }
 0x23d   :  { %s624_s17 = smov 1  }
 0x23e   :  { %369 = dma.vmem_to_hbm [thread:$0]  %s362_s15, 16, %s364_s4, [#allocation4], %s623_s16, %s623_s16, %s624_s17  }
 0x23f   :  { %613 = dma.done.wait [#allocation4], 128  }
 0x240   :  { %614 = vsyncadd [#allocation4], 4294967168 }
 0x241   :  { %374 = vsyncpa [#allocation3], 1 }
 0x242   :  { %375 = vsyncpa [#allocation6], 1 }
 0x243   :  { %376 = vsyncpa [#allocation4], 1 }

</bundles_post_ra>
